<compile_context>
chip_gen: v7x
topology: tpu7x:2x2x1
jax: 0.10.0
libtpu: 0.0.40
codegen_flags: <defaults>
</compile_context>

<pallas_src>
import jax
import jax.numpy as jnp
from jax.experimental import pallas as pl
from jax.experimental.pallas import tpu as pltpu


def _round_up(x, m):
    return (x + m - 1) // m * m


# ----------------------------------------------------------------------------
# Pallas kernel: out(OC_pad, L_tile) = sum_k W(OC_pad, tk) @ patches(tk, L_tile)
#                + bias(OC_pad, 1)        (lane-dense output, f32 accumulator)
# ----------------------------------------------------------------------------
def _convmm_kernel(w_ref, b_ref, a_ref, o_ref, acc_ref):
    k = pl.program_id(2)

    @pl.when(k == 0)
    def _():
        acc_ref[...] = jnp.zeros_like(acc_ref)

    acc_ref[...] += jnp.dot(
        w_ref[...], a_ref[...], preferred_element_type=jnp.float32
    )

    @pl.when(k == pl.num_programs(2) - 1)
    def _():
        o_ref[...] = (acc_ref[...] + b_ref[...]).astype(o_ref.dtype)


def conv_matmul_pallas(w_flat, bias, patches, *, tl_max=512, tk_max=512,
                       mxu_dtype=jnp.float32):
    """w_flat: (OC, K), bias: (OC,), patches: (N, K, L)  ->  (N, OC, L) f32.

    Output layout is (OC, L) per image, i.e. already NCHW-flattened, so no
    transpose is needed by the caller.
    """
    OC, K = w_flat.shape
    N, K2, L = patches.shape
    assert K2 == K

    OC_pad = _round_up(OC, 8)                      # sublane axis of the output
    tk = min(tk_max, _round_up(K, 8))              # contraction tile
    K_pad = _round_up(K, tk)
    tl = min(tl_max, _round_up(L, 128))            # lane axis tile (>=128-dense)
    L_pad = _round_up(L, tl)

    # Pad once in the wrapper (zeros in K contribute nothing; OC/L pad sliced off).
    w_p = jnp.zeros((OC_pad, K_pad), mxu_dtype).at[:OC, :K].set(
        w_flat.astype(mxu_dtype))
    a_p = jnp.zeros((N, K_pad, L_pad), mxu_dtype).at[:, :K, :L].set(
        patches.astype(mxu_dtype))
    b_p = jnp.zeros((OC_pad, 1), jnp.float32).at[:OC, 0].set(
        bias.astype(jnp.float32))

    grid = (N, L_pad // tl, K_pad // tk)

    itemsize = jnp.dtype(mxu_dtype).itemsize
    cost = pl.CostEstimate(
        flops=2 * N * L_pad * K_pad * OC_pad,
        transcendentals=0,
        bytes_accessed=(N * K_pad * L_pad + OC_pad * K_pad) * itemsize
        + OC_pad * 4 + N * OC_pad * L_pad * 4,
    )

    # NOTE: weight/bias blocks have constant index maps so Pallas does not
    # re-DMA them per step; pipeline_mode=pl.Buffered(1) could further halve
    # their VMEM footprint for very large layers.
    out = pl.pallas_call(
        _convmm_kernel,
        out_shape=jax.ShapeDtypeStruct((N, OC_pad, L_pad), jnp.float32),
        grid_spec=pltpu.PrefetchScalarGridSpec(
            num_scalar_prefetch=0,
            grid=grid,
            in_specs=[
                pl.BlockSpec((OC_pad, tk), lambda n, l, k: (0, k)),   # weight
                pl.BlockSpec((OC_pad, 1), lambda n, l, k: (0, 0)),    # bias
                pl.BlockSpec((None, tk, tl), lambda n, l, k: (n, k, l)),  # patches
            ],
            out_specs=pl.BlockSpec((None, OC_pad, tl), lambda n, l, k: (n, 0, l)),
            scratch_shapes=[pltpu.VMEM((OC_pad, tl), jnp.float32)],
        ),
        compiler_params=pltpu.CompilerParams(
            dimension_semantics=("parallel", "parallel", "arbitrary"),
            vmem_limit_bytes=32 * 1024 * 1024,
        ),
        cost_estimate=cost,
    )(w_p, b_p, a_p)

    return out[:, :OC, :L]


# ----------------------------------------------------------------------------
# Glue: im2col (nn.Unfold semantics) in plain JAX -> (N, C*kh*kw, L)
# ----------------------------------------------------------------------------
def im2col_nchw(x, kh, kw, stride, padding):
    N, C, H, W = x.shape
    xp = jnp.pad(x, ((0, 0), (0, 0), (padding, padding), (padding, padding)))
    out_h = (H + 2 * padding - kh) // stride + 1
    out_w = (W + 2 * padding - kw) // stride + 1
    cols = []
    for i in range(kh):
        for j in range(kw):
            cols.append(
                xp[:, :, i:i + stride * out_h:stride, j:j + stride * out_w:stride]
            )
    # (N, C, kh*kw, out_h, out_w); C varies slowest -> matches nn.Unfold order
    patches = jnp.stack(cols, axis=2)
    patches = patches.reshape(N, C * kh * kw, out_h * out_w)
    return patches, out_h, out_w


# ----------------------------------------------------------------------------
# UnfoldConv2d-equivalent layer (forward only, float path) + SimModel wrapper
# ----------------------------------------------------------------------------
class UnfoldConv2dPallas:
    def __init__(self, weight, bias, stride=1, padding=1,
                 mxu_dtype=jnp.float32):
        # weight: (OC, C, kh, kw), bias: (OC,)
        self.weight = weight
        self.bias = bias
        self.stride = stride
        self.padding = padding
        # mxu_dtype=jnp.bfloat16 recommended on v6e/v7x for large layers.
        self.mxu_dtype = mxu_dtype
        # toggles mirrored from the PyTorch module (float/default path here)
        self._unfold = True
        self._quantize = False       # TODO(synk): quantized path not modelled
        self._custom_matmul = True
        self._layer_number = 0

    def __call__(self, x):
        OC, C, kh, kw = self.weight.shape
        N = x.shape[0]
        patches, out_h, out_w = im2col_nchw(x, kh, kw, self.stride, self.padding)
        w_flat = self.weight.reshape(OC, C * kh * kw)           # (OC, K)
        out = conv_matmul_pallas(w_flat, self.bias, patches,
                                 mxu_dtype=self.mxu_dtype)      # (N, OC, L)
        # Already (N, OC, L) -> just reshape to NCHW, no transpose needed.
        return out.reshape(N, OC, out_h, out_w)


class SimModelPallas:
    """Mirrors SimModel's bookkeeping; forward delegates to its unfold layers."""

    def __init__(self, layers):
        self.unfold_list = list(layers)

    def set_unfold(self, v):
        for l in self.unfold_list:
            l._unfold = v

    def set_custom_matmul(self, v):
        for l in self.unfold_list:
            l._custom_matmul = v

    def set_layer_number(self):
        for i, l in enumerate(self.unfold_list):
            l._layer_number = i

    def __call__(self, x):
        for l in self.unfold_list:
            x = l(x)
        return x


# ----------------------------------------------------------------------------
# main
# ----------------------------------------------------------------------------
if __name__ == "__main__":
    key = jax.random.PRNGKey(0)
    kx, kw, kb = jax.random.split(key, 3)

    # Small shapes consistent with an NCHW conv: N=2, C=4, H=W=16, OC=8, 3x3
    N, C, H, W = 2, 4, 16, 16
    OC, KH, KW = 8, 3, 3

    x = jax.random.normal(kx, (N, C, H, W), dtype=jnp.float32)
    weight = jax.random.normal(kw, (OC, C, KH, KW), dtype=jnp.float32) * 0.1
    bias = jax.random.normal(kb, (OC,), dtype=jnp.float32) * 0.1

    layer = UnfoldConv2dPallas(weight, bias, stride=1, padding=1)
    model = SimModelPallas([layer])
    model.set_layer_number()

    out = model(x)
    out = jax.block_until_ready(out)

    # Reference (pure JAX conv) to check the Pallas hot path
    ref = jax.lax.conv_general_dilated(
        x, weight, window_strides=(1, 1), padding=((1, 1), (1, 1)),
        dimension_numbers=("NCHW", "OIHW", "NCHW"),
    ) + bias.reshape(1, OC, 1, 1)

    assert out.shape == (N, OC, H, W), out.shape
    assert jnp.allclose(out, ref, atol=1e-4, rtol=1e-4), "mismatch vs reference"
    print("KERNEL_OK")
</pallas_src>

<mosaic_0001>
module attributes {stable_mosaic.version = 11 : i64} {
  func.func @_convmm_kernel(%arg0: i32, %arg1: i32, %arg2: i32, %arg3: memref<8x40xf32, #tpu.memory_space<vmem>>, %arg4: memref<8x1xf32, #tpu.memory_space<vmem>>, %arg5: memref<1x40x256xf32, #tpu.memory_space<vmem>>, %arg6: memref<1x8x256xf32, #tpu.memory_space<vmem>>, %arg7: memref<8x256xf32, #tpu.memory_space<vmem>>) attributes {dimension_semantics = [#tpu.dimension_semantics<parallel>, #tpu.dimension_semantics<parallel>, #tpu.dimension_semantics<arbitrary>], iteration_bounds = array<i64: 2, 1, 1>, scalar_prefetch = 0 : i64, scratch_operands = 1 : i64, tpu.core_type = #tpu.core_type<tc>, window_params = [{transform_indices = @transform_0, window_bounds = array<i64: 8, 40>}, {pipeline_mode = #tpu.pipeline_mode<synchronous>, transform_indices = @transform_1, window_bounds = array<i64: 8, 1>}, {transform_indices = @transform_2, window_bounds = array<i64: 1, 40, 256>}, {transform_indices = @transform_3, window_bounds = array<i64: 1, 8, 256>}]} {
    %c0_i32 = arith.constant 0 : i32
    %0 = arith.cmpi eq, %arg2, %c0_i32 : i32
    %1 = arith.extui %0 : i1 to i32
    %c0_i32_0 = arith.constant 0 : i32
    %2 = arith.cmpi ne, %1, %c0_i32_0 : i32
    scf.if %2 {
      %cst_11 = arith.constant 0.000000e+00 : f32
      %13 = vector.broadcast %cst_11 : f32 to vector<8x256xf32>
      %c0_12 = arith.constant 0 : index
      %c0_13 = arith.constant 0 : index
      %14 = vector.load %arg7[%c0_12, %c0_13] : memref<8x256xf32, #tpu.memory_space<vmem>>, vector<8x256xf32>
      tpu.vector_store %arg7[%c0_12, %c0_13], %13 {strides = array<i32>} : memref<8x256xf32, #tpu.memory_space<vmem>>, vector<8x256xf32>,
    } else {
    }
    %c0 = arith.constant 0 : index
    %c0_1 = arith.constant 0 : index
    %3 = vector.load %arg7[%c0, %c0_1] : memref<8x256xf32, #tpu.memory_space<vmem>>, vector<8x256xf32>
    %c0_2 = arith.constant 0 : index
    %c0_3 = arith.constant 0 : index
    %4 = vector.load %arg3[%c0_2, %c0_3] : memref<8x40xf32, #tpu.memory_space<vmem>>, vector<8x40xf32>
    %c0_4 = arith.constant 0 : index
    %c0_5 = arith.constant 0 : index
    %c0_6 = arith.constant 0 : index
    %5 = vector.load %arg5[%c0_4, %c0_5, %c0_6] : memref<1x40x256xf32, #tpu.memory_space<vmem>>, vector<1x40x256xf32>
    %6 = vector.shape_cast %5 : vector<1x40x256xf32> to vector<40x256xf32>
    %cst = arith.constant dense<0.000000e+00> : vector<8x256xf32>
    %7 = tpu.matmul %4, %6, %cst {dimension_numbers = #tpu.dot_dimension_numbers<[1], [0], [0], [1], [0, 0, 1, 1], [], []>} : vector<8x40xf32>, vector<40x256xf32>, vector<8x256xf32> -> vector<8x256xf32>
    %8 = arith.addf %3, %7 : vector<8x256xf32>
    %c0_7 = arith.constant 0 : index
    %c0_8 = arith.constant 0 : index
    %9 = vector.load %arg7[%c0_7, %c0_8] : memref<8x256xf32, #tpu.memory_space<vmem>>, vector<8x256xf32>
    tpu.vector_store %arg7[%c0_7, %c0_8], %8 {strides = array<i32>} : memref<8x256xf32, #tpu.memory_space<vmem>>, vector<8x256xf32>,
    %c0_i32_9 = arith.constant 0 : i32
    %10 = arith.cmpi eq, %arg2, %c0_i32_9 : i32
    %11 = arith.extui %10 : i1 to i32
    %c0_i32_10 = arith.constant 0 : i32
    %12 = arith.cmpi ne, %11, %c0_i32_10 : i32
    scf.if %12 {
      %c0_11 = arith.constant 0 : index
      %c0_12 = arith.constant 0 : index
      %13 = vector.load %arg7[%c0_11, %c0_12] : memref<8x256xf32, #tpu.memory_space<vmem>>, vector<8x256xf32>
      %c0_13 = arith.constant 0 : index
      %c0_14 = arith.constant 0 : index
      %14 = vector.load %arg4[%c0_13, %c0_14] : memref<8x1xf32, #tpu.memory_space<vmem>>, vector<8x1xf32>
      %15 = vector.broadcast %14 : vector<8x1xf32> to vector<8x256xf32>
      %16 = arith.addf %13, %15 : vector<8x256xf32>
      %c0_15 = arith.constant 0 : index
      %c0_16 = arith.constant 0 : index
      %c0_17 = arith.constant 0 : index
      %17 = vector.load %arg6[%c0_15, %c0_16, %c0_17] : memref<1x8x256xf32, #tpu.memory_space<vmem>>, vector<1x8x256xf32>
      %18 = vector.shape_cast %17 : vector<1x8x256xf32> to vector<8x256xf32>
      %19 = vector.shape_cast %16 : vector<8x256xf32> to vector<1x8x256xf32>
      tpu.vector_store %arg6[%c0_15, %c0_16, %c0_17], %19 {strides = array<i32>} : memref<1x8x256xf32, #tpu.memory_space<vmem>>, vector<1x8x256xf32>,
    } else {
    }
    return
  }
  func.func @transform_0(%arg0: i32, %arg1: i32, %arg2: i32) -> (i32, i32) {
    %c0_i32 = arith.constant 0 : i32
    %c0_i32_0 = arith.constant 0 : i32
    return %c0_i32, %arg2 : i32, i32
  }
  func.func @transform_1(%arg0: i32, %arg1: i32, %arg2: i32) -> (i32, i32) {
    %c0_i32 = arith.constant 0 : i32
    %c0_i32_0 = arith.constant 0 : i32
    %c0_i32_1 = arith.constant 0 : i32
    return %c0_i32, %c0_i32_0 : i32, i32
  }
  func.func @transform_2(%arg0: i32, %arg1: i32, %arg2: i32) -> (i32, i32, i32) {
    %c0_i32 = arith.constant 0 : i32
    return %arg0, %arg2, %arg1 : i32, i32, i32
  }
  func.func @transform_3(%arg0: i32, %arg1: i32, %arg2: i32) -> (i32, i32, i32) {
    %c0_i32 = arith.constant 0 : i32
    %c0_i32_0 = arith.constant 0 : i32
    return %arg0, %c0_i32, %arg1 : i32, i32, i32
  }
}

</mosaic_0001>

<bundles_post_ra>
// kernel: tpu_custom_call.1
= control target key start
LH: loop header
LB: loop body
LE: loop exit
PB: predicated region body
PF: predicated region fallthrough
CT: control target
= control target key end

     0   :  { %8 = vsyncpa [#allocation4], 0  ;;  %s886_s0 = inlined_call_operand.vmem [shape: f32[8,40], index: 0, kind: input, shape index: {}]   ;;  %s887_s1 = inlined_call_operand.vmem [shape: f32[8,1], index: 1, kind: input, shape index: {}]   ;;  %s888_s2 = inlined_call_operand.hbm [shape: f32[2,40,256], index: 2, kind: input, shape index: {}]   ;;  %s889_s3 = inlined_call_operand.hbm [shape: f32[2,8,256], index: 3, kind: output, shape index: {}]  }
   0x1   :  { %10 = vsyncpa [#allocation4 + $0x1], 0 }
   0x2   :  { %11 = vsyncpa [#allocation5], 0 }
   0x3   :  { %13 = vsyncpa [#allocation5 + $0x1], 0  ;;  %s706_s12 = smov 0   ;;  %s708_s13 = smov 0  }
   0x4   :  { %s710_s14 = smov 0   ;;  %s712_s15 = smov 0  }
   0x5   :  { %s714_s16 = smov 0   ;;  %s716_s17 = smov 0  }
   0x6 LB: > { %s473_s18 = sadd.s32 4294967295, %s678_s17   ;;  %s474_s19 = sadd.s32 4294967294, %s678_s17   ;;  %s678_s17 = sphi %s716_s17, %s19_s17   ;;  %s674_s16 = sphi %s714_s16, %s904_s16   ;;  %s670_s15 = sphi %s712_s15, %s903_s15   ;;  %s666_s14 = sphi %s710_s14, %s902_s14   ;;  %s662_s13 = sphi %s708_s13, %s901_s13   ;;  %s658_s12 = sphi %s706_s12, %s900_s12  }
   0x7   : > { %s38_s20 = sadd.s32 1, %s674_s16  ;;  %s96_s21 = sadd.s32 1, %s666_s14 }
   0x8   : > { %p40_p0 = scmp.ge.s32.totalorder %s38_s20, 2  ;;  %p103_p1 = scmp.ne.s32.totalorder %s666_s14, %s662_s13 }
   0x9   : > { %p104_p2 = scmp.eq.s32.totalorder %s678_s17, 0  ;;  %p109_p3 = scmp.ne.s32.totalorder %s662_s13, %s658_s12 }
   0xa   : > { %s906_s20 = smov (%p40_p0, %s38_s20), 0  ;;  %p110_p5 = scmp.eq.s32.totalorder %s473_s18, 0 }
   0xb   : > { %p747_p4 = por %p104_p2, %p103_p1  ;;  %s89_s23 = ssub.s32 %s674_s16, %s906_s20 }
   0xc   : > { %p135_p6 = scmp.eq.s32.totalorder %s473_s18, 1  ;;  %p94_p7 = scmp.eq.s32.totalorder %s89_s23, 0 }
   0xd   : > { %p753_p8 = por %p110_p5, %p109_p3  ;;  %p141_p10 = scmp.eq.s32.totalorder %s474_s19, 1 }
   0xe   : > { %p757_p9 = por %p135_p6, %p103_p1  ;;  %p511_p13 = scmp.lt.s32.totalorder %s678_s17, 2 }
   0xf   : > { %s762_s26 = scalar_select %p94_p7, %s666_s14, %s96_s21  }
  0x10   : > { %s893_s25 = scalar_select %p757_p9, 1, 0 }
  0x11   : > { %p764_p11 = por %p141_p10, %p109_p3  ;;  %s171_s28 = sand.u32 1, %s666_s14  }
  0x12   : > { %s496_s29 = smul.u32 80, %s171_s28  ;;  %p774_p0 = pnand %p511_p13, %p747_p4 }
  0x13   : > { %s894_s27 = scalar_select %p764_p11, 1, 0 }
  0x14   : > { %s497_s30 = smul.u32 1280, %s674_s16  ;;  %s175_s8 = scalar_lea.vmem [#allocation3], %s496_s29 }
  0x15   : > { %s187_s9 = sshll.u32 %s175_s8, 4  ;;  %s786_s10 = scalar_lea.sflag [#allocation4], %s171_s28  ;;  %s783_s9 = int_to_ptr.vmem [resolvable:$true] %s187_s9 }
  0x16   : > { %s781_s7 = scalar_lea.hbm %s888_s2, %s497_s30  ;;  %p568_p3 = pneg %p774_p0 }
  0x17   : > { %s566_s11 = scalar_lea.hbm %s781_s7, 1280  ;;  %s571_s21 = scalar_lea.hbm %s888_s2, 2560 }
  0x18   : > { %p567_p2 = scmp.ne.s32.totalorder %s781_s7, %s566_s11  ;;  %p572_p6 = scmp.lt.u32.totalorder %s781_s7, %s888_s2 }
  0x19   : > { %p573_p7 = scmp.lt.u32.totalorder %s571_s21, %s566_s11  ;;  %p575_p13 = scmp.lt.u32.totalorder %s566_s11, %s781_s7 }
  0x1a   : > { %p569_p4 = pnand %p568_p3, %p567_p2 }
  0x1b   : > { %p574_p10 = por %p573_p7, %p572_p6 }
  0x1c   : > { %p570_p5 = pneg %p569_p4 }
  0x1d   : > { %p576_p12 = por %p575_p13, %p574_p10 }
  0x1f   : > { %p577_p1 = pnand %p576_p12, %p570_p5 }
  0x21   : > { %580 = shalt.err (!%p577_p1)
}
  0x22   : > { %s581_s28 = scalar_lea.vmem %s783_s9, 1280  ;;  %s680_s29 = smov [#allocation3]  }
  0x23   : > { %p582_p2 = scmp.ne.s32.totalorder %s783_s9, %s581_s28  ;;  %s586_s30 = sshll.u32 %s680_s29, 4  ;;  %s587_s30 = int_to_ptr.vmem [resolvable:$false] %s586_s30 }
  0x24   : > { %s588_s5 = scalar_lea.vmem %s587_s30, 2560  ;;  %p589_p9 = scmp.lt.s32.totalorder %s783_s9, %s587_s30 }
  0x25   : > { %p584_p4 = pnand %p582_p2, %p568_p3  ;;  %p590_p6 = scmp.lt.s32.totalorder %s588_s5, %s581_s28 }
  0x27   : > { %p585_p11 = pneg %p584_p4  ;;  %p591_p7 = por %p590_p6, %p589_p9 }
  0x29   : > { %p592_p10 = pnand %p591_p7, %p585_p11 }
  0x2b   : > { %595 = shalt.err (!%p592_p10)
}
  0x2c   : > { %s681_s6 = smov 256   ;;  %s682_s8 = smov 16  }
  0x2d   : > { %506 = dma.hbm_to_vmem [thread:$0]  (!%p774_p0), %s781_s7, 1280, %s783_s9, %s786_s10, %s681_s6, %s681_s6, %s682_s8  }
  0x2e   : > { %p195_p12 = scmp.lt.s32.totalorder %s678_s17, 3  ;;  %p896_p1 = scmp.ge.s32.totalorder %s678_s17, 1 }
  0x30   : > { %p196_p3 = pnand %p896_p1, %p195_p12 }
  0x31   : > { %s818_s11 = sand.u32 (!%p196_p3), 1, %s662_s13  }
  0x32   : > { %199 = sbr.rel (%p196_p3) target bundleno = 300 (0x12c), region = 32  ;;  %s202_s19 = scalar_lea.sflag (!%p196_p3), [#allocation4], %s818_s11 }
  0x33   : > { %s498_s18 = smul.u32 (!%p196_p3), 80, %s818_s11 }
  0x35   : > { %s205_s21 = scalar_lea.vmem (!%p196_p3), [#allocation3], %s498_s18 }
  0x39   : > { %649 = dma.done.wait (%p753_p8), %s202_s19, 1280  }
  0x3a   : > { %651 = vsyncadd (%p753_p8), %s202_s19, 4294966016  ;;  %v683_v0 = vmov 0.0   ;;  %v684_v1 = vmov 0   ;;  %v249_v2 = vld [vmem:[%s205_s21 + $0x8] sm:$0xff]  ;;  %v251_v3 = vld [vmem:[%s205_s21 + $0x18] sm:$0xff]  ;;  %vm258_vm0 = vcmask 326656  }
  0x3b   : > { %326 = vmatprep.mubr.f32.mxu0 %v683_v0  ;;  %565 = vset.pattern.permute.xlu0 %v684_v1  ;;  %v248_v4 = vld [vmem:[%s205_s21] sm:$0xff]  ;;  %v488_v5 = vpack.c.bf16 %v251_v3, %v249_v2  ;;  %v250_v6 = vld [vmem:[%s205_s21 + $0x10] sm:$0xff]  ;;  %v253_v7 = vld [vmem:[%s205_s21 + $0x28] sm:$0xff]  ;;  %s480_s10 = sshll.u32 %s818_s11, 4  ;;  %s487_s22 = sshll.u32 %s670_s15, 8 }
  0x3c   : > { %v255_v8 = vld [vmem:[%s205_s21 + $0x38] sm:$0xff]  ;;  %v490_v9 = vpack.c.bf16 %v250_v6, %v248_v4  ;;  %v252_v11 = vld [vmem:[%s205_s21 + $0x20] sm:$0xff]  ;;  %v254_v12 = vld [vmem:[%s205_s21 + $0x30] sm:$0xff]  ;;  %s231_s23 = scalar_lea.vmem [#allocation6], %s480_s10  ;;  %s837_s5 = scalar_lea.hbm %s889_s3, %s487_s22 }
  0x3d   : > { %v492_v10 = vpack.c.bf16 %v255_v8, %v253_v7  ;;  %489 = vmatprep.subr.bf16.mxu0 %v488_v5  ;;  %v342_v13 = vld [vmem:[%s887_s1] sm:$0xff]  ;;  %v494_v14 = vpack.c.bf16 %v254_v12, %v252_v11  ;;  %v257_v15 = vld [vmem:[%s205_s21 + $0x48] sm:$0xff]  ;;  %s369_s28 = sshll.u32 %s231_s23, 4  ;;  %s353_s6 = scalar_lea.sflag [#allocation5], %s818_s11  ;;  %s839_s28 = int_to_ptr.vmem [resolvable:$true] %s369_s28 }
  0x3e   : > { %491 = vmatpush1.bf16.msra.mxu0 %v490_v9  ;;  %345 = vperm.xlu0 %565, %v342_v13   ;;  %v256_v16 = vld [vmem:[%s205_s21 + $0x40] sm:$0xff]  ;;  %s596_s15 = scalar_lea.vmem %s839_s28, 256  ;;  %p897_p9 = scmp.ne.s32.totalorder %s893_s25, 0 }
  0x3f   : > { %493 = vmatprep.subr.bf16.mxu0 %v492_v10  ;;  %v247_v17 = vld [vmem:[%s886_s0] sm:$0xff]  ;;  %p597_p8 = scmp.ne.s32.totalorder %s839_s28, %s596_s15  ;;  %s685_s8 = smov [#allocation6]  }
  0x40   : > { %s600_s18 = sshll.u32 %s685_s8, 4  ;;  %s601_s18 = int_to_ptr.vmem [resolvable:$false] %s600_s18 }
  0x41   : > { %p598_p11 = pnand %p597_p8, %p897_p9  ;;  %s602_s19 = scalar_lea.vmem %s601_s18, 512 }
  0x42   : > { %495 = vmatpush1.bf16.msra.mxu0 %v494_v14  ;;  %p603_p5 = scmp.lt.s32.totalorder %s839_s28, %s601_s18  ;;  %p604_p13 = scmp.lt.s32.totalorder %s602_s19, %s596_s15 }
  0x43   : > { %270 = vmatprep.subr.mxu0 %v257_v15  ;;  %p599_p0 = pneg %p598_p11 }
  0x44   : > { %p605_p2 = por %p604_p13, %p603_p5 }
  0x46   : > { %271 = vmatpush1.msra.mxu0 %v256_v16  ;;  %p606_p4 = pnand %p605_p2, %p599_p0 }
  0x47   : > { %481 = vmatmul.mubr.msk.f32.vlgmr.msra.gmra.mrb[0].mxu0 %vm258_vm0, %v247_v17 }
  0xbd   : > { %v346_v18 = vpop.permute.xlu0 %345 }
 0x11a   : > { %v328_v19 = vpop.f32.mrb[0].mxu0 }
 0x11b   : > { %v348_v20 = vadd.f32 %v346_v18, %v328_v19  ;;  %v330_v21 = vpop.f32.mrb[1].mxu0 }
 0x11c   : > { %v349_v22 = vadd.f32 %v346_v18, %v330_v21 }
 0x11d   : > { %350 = vst [vmem:[%s231_s23] sm:$0xff] %v348_v20 }
 0x11e   : > { %351 = vst [vmem:[%s231_s23 + $0x8] sm:$0xff] %v349_v22 }
 0x11f   : > { %609 = shalt.err (!%p606_p4)
}
 0x120   : > { %s610_s11 = scalar_lea.hbm %s837_s5, 256  ;;  %s614_s24 = scalar_lea.hbm %s889_s3, 512 }
 0x121   : > { %p611_p6 = scmp.ne.s32.totalorder %s837_s5, %s610_s11  ;;  %p615_p12 = scmp.lt.u32.totalorder %s837_s5, %s889_s3 }
 0x122   : > { %p616_p1 = scmp.lt.u32.totalorder %s614_s24, %s610_s11  ;;  %p618_p8 = scmp.lt.u32.totalorder %s610_s11, %s837_s5 }
 0x123   : > { %p612_p7 = pnand %p611_p6, %p897_p9 }
 0x124   : > { %p617_p3 = por %p616_p1, %p615_p12 }
 0x125   : > { %p613_p10 = pneg %p612_p7 }
 0x126   : > { %p619_p11 = por %p618_p8, %p617_p3 }
 0x128   : > { %p620_p0 = pnand %p619_p11, %p613_p10 }
 0x12a   : > { %623 = shalt.err (!%p620_p0)
}
 0x12b   : > { %501 = dma.vmem_to_hbm [thread:$0]  (%p897_p9), %s839_s28, 256, %s837_s5, %s353_s6  }
 0x12c PF: > { %s381_s10 = sand.u32 1, %s658_s12   ;;  %p898_p5 = scmp.ne.s32.totalorder %s894_s27, 0 }
 0x12d   : > { %p899_p13 = scmp.ge.s32.totalorder %s678_s17, 2  ;;  %s382_s22 = scalar_lea.sflag [#allocation5], %s381_s10 }
 0x12f   : > { %p508_p2 = pnand %p899_p13, %p898_p5 }
 0x131   : > { %653 = dma.done.wait (!%p508_p2), %s382_s22, 256  }
 0x132   : > { %655 = vsyncadd (!%p508_p2), %s382_s22, 4294967040  ;;  %s19_s17 = sadd.s32 1, %s678_s17   ;;  %s900_s12 = smov %s662_s13 }
 0x133   : > { %p16_p4 = scmp.ge.s32.totalorder %s19_s17, 4   ;;  %s901_s13 = smov %s666_s14 }
 0x134   : > { %s902_s14 = smov %s762_s26  ;;  %s903_s15 = smov %s674_s16 }
 0x135   : > { %s904_s16 = smov %s906_s20  ;;  %18 = sbr.rel (!%p16_p4) target bundleno = 6 (0x6), region = 88 }
 0x13c   :  { %387 = vsyncpa [#allocation4], 1 }
 0x13d   :  { %389 = vsyncpa [#allocation4 + $0x1], 1 }
 0x13e   :  { %390 = vsyncpa [#allocation5], 1 }
 0x13f   :  { %392 = vsyncpa [#allocation5 + $0x1], 1 }

</bundles_post_ra>
